<compile_context>
chip_gen: v7x
topology: tpu7x:2x2x1
jax: 0.10.0
libtpu: 0.0.40
codegen_flags: <defaults>
</compile_context>

<pallas_src>
import jax
import jax.numpy as jnp
from jax.experimental import pallas as pl
from jax.experimental.pallas import tpu as pltpu


def _round_up(v, m):
    return ((v + m - 1) // m) * m


# ----------------------------------------------------------------------------
# Path 1: K == 1, M == 1  ->  pure VPU broadcast FMA on a lane-dense slab,
# gridded over slab rows.
# ----------------------------------------------------------------------------
def _linear_scalar_kernel(x_ref, w_ref, b_ref, o_ref):
    # x_ref / o_ref: (row_block, 128) lane-dense tiles in VMEM.
    # w_ref, b_ref: (1,) f32 scalars in SMEM.
    w = w_ref[0]
    b = b_ref[0]
    o_ref[...] = (x_ref[...].astype(jnp.float32) * w + b).astype(o_ref.dtype)


def _lr_forward_scalar(x, weight, bias):
    n = x.shape[0]
    dtype = x.dtype

    # Lane-dense slab: rows of 128 lanes, row count rounded to the sublane
    # multiple, blocked into row_block-sized tiles for pipelining.
    rows_needed = (n + 127) // 128
    row_block = min(512, _round_up(rows_needed, 8))
    rows = _round_up(rows_needed, row_block)
    n_pad = rows * 128

    # Wrapper-side pad/reshape (an extra HBM roundtrip only matters at very
    # large N; for this module's N=100 launch overhead dominates).
    x_slab = jnp.pad(x.reshape(n), (0, n_pad - n)).reshape(rows, 128)
    w_s = weight.reshape(1).astype(jnp.float32)
    b_s = bias.reshape(1).astype(jnp.float32)

    out = pl.pallas_call(
        _linear_scalar_kernel,
        out_shape=jax.ShapeDtypeStruct((rows, 128), dtype),
        grid=(rows // row_block,),
        in_specs=[
            pl.BlockSpec((row_block, 128), lambda i: (i, 0)),        # x slab tile
            pl.BlockSpec(memory_space=pltpu.MemorySpace.SMEM),       # weight scalar
            pl.BlockSpec(memory_space=pltpu.MemorySpace.SMEM),       # bias scalar
        ],
        out_specs=pl.BlockSpec((row_block, 128), lambda i: (i, 0)),
        compiler_params=pltpu.CompilerParams(
            dimension_semantics=("parallel",)),
    )(x_slab, w_s, b_s)

    return out.reshape(n_pad)[:n].reshape(n, 1)


# ----------------------------------------------------------------------------
# Path 2: general tiled matmul on the MXU.
# ----------------------------------------------------------------------------
def _linear_tiled_kernel_f32(x_ref, w_ref, b_ref, o_ref):
    # f32 output: accumulate directly into the resident output block.
    k = pl.program_id(2)

    @pl.when(k == 0)
    def _():
        # Bias as the initializer == bias-add at the end, but free.
        o_ref[...] = jnp.broadcast_to(b_ref[...], o_ref.shape)

    o_ref[...] += jnp.dot(x_ref[...], w_ref[...],
                          preferred_element_type=jnp.float32)


def _linear_tiled_kernel_acc(x_ref, w_ref, b_ref, o_ref, acc_ref):
    # Narrow output dtype: keep an f32 accumulator in scratch.
    k = pl.program_id(2)

    @pl.when(k == 0)
    def _():
        acc_ref[...] = jnp.zeros_like(acc_ref)

    acc_ref[...] += jnp.dot(x_ref[...], w_ref[...],
                            preferred_element_type=jnp.float32)

    @pl.when(k == pl.num_programs(2) - 1)
    def _():
        o_ref[...] = (acc_ref[...] + b_ref[...].astype(jnp.float32)
                      ).astype(o_ref.dtype)


def _lr_forward_tiled(x, weight, bias):
    n, k = x.shape
    m = weight.shape[0]
    dtype = x.dtype
    itemsize = jnp.dtype(dtype).itemsize
    sub = {4: 8, 2: 16, 1: 32}.get(itemsize, 8)   # dtype-aware sublane multiple

    # 512/512/1024 f32 tiles: x 2 MiB x2 bufs + w 2 MiB x2 + out 1 MiB x2
    # (+1 MiB acc for narrow dtypes) ~= 11 MiB per step -> fits the 32 MiB
    # scoped-VMEM default on v5e/v6e/v7x.  Clamped to the padded problem.
    tm = min(512, _round_up(n, sub))
    tn = min(512, _round_up(m, 128))
    tk = min(1024, _round_up(k, 128))

    n_pad = _round_up(n, tm)
    m_pad = _round_up(m, tn)
    k_pad = _round_up(k, tk)

    # If the parallel (i, j) grid collapses to a single block, split N so both
    # v7x TensorCores get work (no-op change of semantics).
    if (n_pad // tm == 1 and m_pad // tn == 1
            and n_pad % (2 * sub) == 0 and n_pad // 2 >= sub):
        tm = n_pad // 2

    grid = (n_pad // tm, m_pad // tn, k_pad // tk)

    x_p = jnp.pad(x, ((0, n_pad - n), (0, k_pad - k)))
    # One-time wrapper transpose to (K, M): the per-step contraction is then a
    # plain NN matmul, guaranteeing no per-tile XLU transpose inside the loop.
    w_p = jnp.pad(weight.T, ((0, k_pad - k), (0, m_pad - m)))     # (K_pad, M_pad)
    b_p = jnp.pad(bias, (0, m_pad - m)).reshape(1, m_pad)

    # bytes_accessed includes re-streaming: x is read m_pad/tn times, w is
    # read n_pad/tm times under the (i, j, k) grid.
    reads = (n_pad * k_pad * (m_pad // tn)
             + k_pad * m_pad * (n_pad // tm)
             + m_pad * (n_pad // tm)) * itemsize
    writes = n_pad * m_pad * itemsize
    cost = pl.CostEstimate(flops=2 * n * k * m, transcendentals=0,
                           bytes_accessed=reads + writes)

    if dtype == jnp.float32:
        kernel = _linear_tiled_kernel_f32
        scratch = []
    else:
        kernel = _linear_tiled_kernel_acc
        scratch = [pltpu.VMEM((tm, tn), jnp.float32)]

    out = pl.pallas_call(
        kernel,
        out_shape=jax.ShapeDtypeStruct((n_pad, m_pad), dtype),
        grid_spec=pltpu.PrefetchScalarGridSpec(
            num_scalar_prefetch=0,
            grid=grid,
            in_specs=[
                pl.BlockSpec((tm, tk), lambda i, j, kk: (i, kk)),   # x
                pl.BlockSpec((tk, tn), lambda i, j, kk: (kk, j)),   # weight (K,M)
                pl.BlockSpec((1, tn), lambda i, j, kk: (0, j)),     # bias row
            ],
            out_specs=pl.BlockSpec((tm, tn), lambda i, j, kk: (i, j)),
            scratch_shapes=scratch,
        ),
        compiler_params=pltpu.CompilerParams(
            dimension_semantics=("parallel", "parallel", "arbitrary")),
        cost_estimate=cost,
    )(x_p, w_p, b_p)

    return out[:n, :m]


# ----------------------------------------------------------------------------
# Public forward (dispatches on static shapes).
# ----------------------------------------------------------------------------
def lr_forward(x, weight, bias):
    """y = x @ weight.T + bias  (PyTorch nn.Linear semantics)."""
    n, k = x.shape
    m, k2 = weight.shape
    assert k == k2, "in_features mismatch"
    assert bias.shape == (m,), "bias shape mismatch"

    # Degenerate 1x1 linear (the shape the spec module runs): gridded VPU
    # path — per-step VMEM is bounded by the row block, so no size guard.
    if k == 1 and m == 1:
        return _lr_forward_scalar(x, weight, bias)
    return _lr_forward_tiled(x, weight, bias)


def init_lr_params(key, input_size, output_size, dtype=jnp.float32):
    """Deterministic init matching nn.Linear's U(-1/sqrt(fan_in), 1/sqrt(fan_in))."""
    kw, kb = jax.random.split(key)
    bound = 1.0 / jnp.sqrt(jnp.asarray(input_size, dtype))
    weight = jax.random.uniform(kw, (output_size, input_size), dtype,
                                minval=-bound, maxval=bound)
    bias = jax.random.uniform(kb, (output_size,), dtype,
                              minval=-bound, maxval=bound)
    return weight, bias


if __name__ == "__main__":
    key = jax.random.PRNGKey(0)
    k_x, k_params, k_x2, k_params2 = jax.random.split(key, 4)

    # --- Spec shapes: X = torch.randn(100, 1) * 10 ; LR(1, 1) -> VPU path ---
    n, input_size, output_size = 100, 1, 1
    x = jax.random.normal(k_x, (n, input_size), jnp.float32) * 10.0
    weight, bias = init_lr_params(k_params, input_size, output_size)

    y = jax.block_until_ready(lr_forward(x, weight, bias))
    y_ref = x @ weight.T + bias
    assert y.shape == (n, output_size)
    assert jnp.allclose(y, y_ref, atol=1e-5, rtol=1e-5)

    # --- General (tiled MXU) path sanity check at small non-toy shapes ---
    n2, in2, out2 = 64, 40, 24
    x2 = jax.random.normal(k_x2, (n2, in2), jnp.float32)
    w2, b2 = init_lr_params(k_params2, in2, out2)
    y2 = jax.block_until_ready(lr_forward(x2, w2, b2))
    y2_ref = x2 @ w2.T + b2
    assert y2.shape == (n2, out2)
    assert jnp.allclose(y2, y2_ref, atol=1e-4, rtol=1e-4)

    print("KERNEL_OK")
</pallas_src>

<mosaic_0001>
module attributes {stable_mosaic.version = 11 : i64} {
  func.func @_linear_scalar_kernel(%arg0: i32, %arg1: memref<8x128xf32, #tpu.memory_space<vmem>>, %arg2: memref<1xf32, #tpu.memory_space<smem>>, %arg3: memref<1xf32, #tpu.memory_space<smem>>, %arg4: memref<8x128xf32, #tpu.memory_space<vmem>>) attributes {dimension_semantics = [#tpu.dimension_semantics<parallel>], iteration_bounds = array<i64: 1>, scalar_prefetch = 0 : i64, scratch_operands = 0 : i64, tpu.core_type = #tpu.core_type<tc>, window_params = [{transform_indices = @transform_0, window_bounds = array<i64: 8, 128>}, {transform_indices = @transform_1, window_bounds = array<i64: 1>}, {transform_indices = @transform_2, window_bounds = array<i64: 1>}, {transform_indices = @transform_3, window_bounds = array<i64: 8, 128>}]} {
    %c0 = arith.constant 0 : index
    %0 = memref.load %arg2[%c0] : memref<1xf32, #tpu.memory_space<smem>>
    %c0_0 = arith.constant 0 : index
    %1 = memref.load %arg3[%c0_0] : memref<1xf32, #tpu.memory_space<smem>>
    %c0_1 = arith.constant 0 : index
    %c0_2 = arith.constant 0 : index
    %2 = vector.load %arg1[%c0_1, %c0_2] : memref<8x128xf32, #tpu.memory_space<vmem>>, vector<8x128xf32>
    %3 = vector.broadcast %0 : f32 to vector<8x128xf32>
    %4 = arith.mulf %2, %3 : vector<8x128xf32>
    %5 = vector.broadcast %1 : f32 to vector<8x128xf32>
    %6 = arith.addf %4, %5 : vector<8x128xf32>
    %c0_3 = arith.constant 0 : index
    %c0_4 = arith.constant 0 : index
    %7 = vector.load %arg4[%c0_3, %c0_4] : memref<8x128xf32, #tpu.memory_space<vmem>>, vector<8x128xf32>
    tpu.vector_store %arg4[%c0_3, %c0_4], %6 {strides = array<i32>} : memref<8x128xf32, #tpu.memory_space<vmem>>, vector<8x128xf32>,
    return
  }
  func.func @transform_0(%arg0: i32) -> (i32, i32) {
    %c0_i32 = arith.constant 0 : i32
    %c0_i32_0 = arith.constant 0 : i32
    return %arg0, %c0_i32 : i32, i32
  }
  func.func @transform_1(%arg0: i32) -> i32 {
    %c0_i32 = arith.constant 0 : i32
    %c0_i32_0 = arith.constant 0 : i32
    return %c0_i32 : i32
  }
  func.func @transform_2(%arg0: i32) -> i32 {
    %c0_i32 = arith.constant 0 : i32
    %c0_i32_0 = arith.constant 0 : i32
    return %c0_i32 : i32
  }
  func.func @transform_3(%arg0: i32) -> (i32, i32) {
    %c0_i32 = arith.constant 0 : i32
    %c0_i32_0 = arith.constant 0 : i32
    return %arg0, %c0_i32 : i32, i32
  }
}

</mosaic_0001>

<bundles_post_ra>
// kernel: tpu_custom_call.1
= control target key start
LH: loop header
LB: loop body
LE: loop exit
PB: predicated region body
PF: predicated region fallthrough
CT: control target
= control target key end

     0   :  { %10 = vsyncpa [#allocation5], 0  ;;  %s154_s0 = inlined_call_operand.hbm [shape: f32[8,128], index: 0, kind: input, shape index: {}]   ;;  %s155_s1 = inlined_call_operand.<no memory space> [shape: f32[1], index: 1, kind: input, shape index: {}]   ;;  %s156_s2 = inlined_call_operand.<no memory space> [shape: f32[1], index: 2, kind: input, shape index: {}]   ;;  %s157_s3 = inlined_call_operand.hbm [shape: f32[8,128], index: 3, kind: output, shape index: {}]  }
   0x1   :  { %11 = vsyncpa [#allocation6], 0  ;;  %s102_s12 = smov [#allocation4]   ;;  %s54_s16 = scalar_lea.hbm %s154_s0, 128 }
   0x2   :  { %s18_s13 = sshll.u32 %s102_s12, 4  ;;  %p55_p0 = scmp.ne.s32.totalorder %s154_s0, %s54_s16  ;;  %s19_s13 = int_to_ptr.vmem [resolvable:$true] %s18_s13 }
   0x3   :  { %p58_p1 = scmp.lt.u32.totalorder %s54_s16, %s154_s0 }
   0x5   :  { %p60_p2 = pnand %p58_p1, %p55_p0 }
   0x7   :  { %63 = shalt.err (!%p60_p2)
}
   0x8   :  { %s64_s21 = scalar_lea.vmem %s19_s13, 128  ;;  %p69_p4 = scmp.lt.s32.totalorder %s19_s13, %s19_s13 }
   0x9   :  { %p65_p3 = scmp.ne.s32.totalorder %s19_s13, %s64_s21  ;;  %p70_p5 = scmp.lt.s32.totalorder %s64_s21, %s64_s21 }
   0xb   :  { %p71_p6 = por %p70_p5, %p69_p4 }
   0xd   :  { %p72_p7 = pnand %p71_p6, %p65_p3 }
   0xf   :  { %75 = shalt.err (!%p72_p7)
}
  0x10   :  { %21 = dma.hbm_to_vmem [thread:$0]  %s154_s0, 128, %s19_s13, [#allocation5]  }
  0x11   :  { %98 = dma.done.wait [#allocation5], 128  }
  0x12   :  { %99 = vsyncadd [#allocation5], 4294967168  ;;  %v32_v0 = vstv %s155_s1  ;;  %v31_v1 = vld [vmem:[#allocation4] sm:$0xff]  ;;  %v34_v2 = vstv %s156_s2  ;;  %s103_s28 = smov [#allocation7]  }
  0x13   :  { %s43_s29 = sshll.u32 %s103_s28, 4  ;;  %v33_v3 = vmul.f32 %v32_v0, %v31_v1  ;;  %s44_s29 = int_to_ptr.vmem [resolvable:$true] %s43_s29 }
  0x14   :  { %s76_s30 = scalar_lea.vmem %s44_s29, 128  ;;  %p81_p9 = scmp.lt.s32.totalorder %s44_s29, %s44_s29 }
  0x15   :  { %v35_v4 = vadd.f32 %v34_v2, %v33_v3  ;;  %p77_p8 = scmp.ne.s32.totalorder %s44_s29, %s76_s30  ;;  %p82_p10 = scmp.lt.s32.totalorder %s76_s30, %s76_s30 }
  0x17   :  { %36 = vst [vmem:[#allocation7] sm:$0xff] %v35_v4  ;;  %p83_p11 = por %p82_p10, %p81_p9 }
  0x19   :  { %p84_p12 = pnand %p83_p11, %p77_p8 }
  0x1b   :  { %87 = shalt.err (!%p84_p12)
}
  0x1c   :  { %s88_s4 = scalar_lea.hbm %s157_s3, 128 }
  0x1d   :  { %p89_p13 = scmp.ne.s32.totalorder %s157_s3, %s88_s4  ;;  %p92_p0 = scmp.lt.u32.totalorder %s88_s4, %s157_s3 }
  0x1f   :  { %p94_p1 = pnand %p92_p0, %p89_p13 }
  0x21   :  { %97 = shalt.err (!%p94_p1)
}
  0x22   :  { %46 = dma.vmem_to_hbm [thread:$0]  %s44_s29, 128, %s157_s3, [#allocation6]  }
  0x23   :  { %100 = dma.done.wait [#allocation6], 128  }
  0x24   :  { %101 = vsyncadd [#allocation6], 4294967168 }
  0x25   :  { %50 = vsyncpa [#allocation5], 1 }
  0x26   :  { %51 = vsyncpa [#allocation6], 1 }

</bundles_post_ra>
